<compile_context>
chip_gen: v7x
topology: tpu7x:2x2x1
jax: 0.10.0
libtpu: 0.0.40
codegen_flags: <defaults>
</compile_context>

<pallas_src>
import math
from functools import partial

import jax
import jax.numpy as jnp
from jax.experimental import pallas as pl
from jax.experimental.pallas import tpu as pltpu


def _round_up(x, m):
    return ((x + m - 1) // m) * m


def _poly_fourier_kernel(t_ref, f_ref, o_ref, *,
                         max_degree, degree, poly_base_factor, hz_base):
    # t_ref : (1, TP)                  timestamp, P on lanes
    # f_ref : (3, max_degree, D, TP)   fused [poly, sin, cos] coefficient planes
    # o_ref : (D, TP)                  output, P on lanes (dense vst)
    t = t_ref[...]                                   # (1, TP)
    x1 = poly_base_factor * t                        # (1, TP)
    theta = (2.0 * hz_base) * t                      # (1, TP)
    sin_th = jnp.sin(theta)                          # single EUP sin
    cos_th = jnp.cos(theta)                          # single EUP cos

    d, tp = o_ref.shape
    acc = jnp.zeros((d, tp), jnp.float32)

    pow_acc = jnp.ones((1, tp), jnp.float32)         # x1**f_id       (f_id = 0)
    sin_f = jnp.zeros((1, tp), jnp.float32)          # sin(f_id*theta)
    cos_f = jnp.ones((1, tp), jnp.float32)           # cos(f_id*theta)

    # degree/max_degree are static Python ints; only emit live terms.
    n_terms = min(int(degree), int(max_degree))
    for f_id in range(n_terms):
        acc = acc + (f_ref[0, f_id, :, :] * pow_acc      # (D,TP) * (1,TP) broadcast
                     + f_ref[1, f_id, :, :] * sin_f
                     + f_ref[2, f_id, :, :] * cos_f)
        if f_id + 1 < n_terms:                            # skip dead trailing updates
            pow_acc = pow_acc * x1
            sin_next = sin_f * cos_th + cos_f * sin_th    # angle-addition recurrence
            cos_next = cos_f * cos_th - sin_f * sin_th    # (4 VPU FMAs, no EUP)
            sin_f, cos_f = sin_next, cos_next

    o_ref[...] = acc * (1.0 / max_degree)


def poly_fourier_forward(factors, timestamp, degree, *,
                         max_degree, poly_base_factor=1.0, Hz_base_factor=1.0,
                         tp=512):
    """factors: (P, max_degree, D, 3) f32; timestamp: (P, 1) f32; degree: python int.

    Returns (P, D) float32, matching PolyFourier.forward.
    """
    P, md, D, C = factors.shape
    assert md == max_degree and C == 3
    hz_base = Hz_base_factor * math.pi

    # Lane tile over P: multiple of 128, don't over-pad tiny problems.
    tp = max(128, min(int(tp), _round_up(P, 128)))
    assert tp % 128 == 0
    p_pad = _round_up(P, tp)

    # Layout plumbing: ONE transpose puts P on the lane axis and fuses the
    # coefficient channel as a leading axis (replaces the three strided
    # channel-split copies of the previous version).
    # TODO(synk): store factors upstream as (3, max_degree, D, P) to skip this
    # transpose's extra HBM round trip entirely.
    f_t = jnp.transpose(factors, (3, 1, 2, 0))       # (3, md, D, P)
    t_t = jnp.transpose(timestamp[:, :1], (1, 0))    # (1, P)
    if p_pad != P:
        f_t = jnp.pad(f_t, ((0, 0), (0, 0), (0, 0), (0, p_pad - P)))
        t_t = jnp.pad(t_t, ((0, 0), (0, p_pad - P)))

    kernel = partial(_poly_fourier_kernel,
                     max_degree=int(max_degree), degree=int(degree),
                     poly_base_factor=float(poly_base_factor),
                     hz_base=float(hz_base))

    out_t = pl.pallas_call(
        kernel,
        out_shape=jax.ShapeDtypeStruct((D, p_pad), jnp.float32),
        grid_spec=pltpu.PrefetchScalarGridSpec(
            num_scalar_prefetch=0,
            grid=(p_pad // tp,),
            in_specs=[pl.BlockSpec((1, tp), lambda i: (0, i)),
                      pl.BlockSpec((3, md, D, tp), lambda i: (0, 0, 0, i))],
            out_specs=pl.BlockSpec((D, tp), lambda i: (0, i)),
        ),
        compiler_params=pltpu.CompilerParams(
            dimension_semantics=("parallel",)),   # P-tiles shard across TCs (v7x)
    )(t_t, f_t)

    return jnp.transpose(out_t, (1, 0))[:P]          # (P, D)


def poly_fourier_reference(factors, timestamp, degree, *,
                           max_degree, poly_base_factor=1.0, Hz_base_factor=1.0):
    """Pure-JAX reference of the taichi forward kernel (direct sin/cos)."""
    hz_base = Hz_base_factor * math.pi
    t = timestamp[:, :1]                              # (P, 1)
    P, md, D, _ = factors.shape
    x1 = poly_base_factor * t                         # (P, 1)
    f_ids = jnp.arange(md, dtype=jnp.float32)         # (md,)
    pows = [jnp.ones_like(x1)]                        # x1**0 == 1 exactly
    for _ in range(1, md):
        pows.append(pows[-1] * x1)
    pows = jnp.stack(pows, axis=1)                    # (P, md, 1)
    x2 = 2.0 * hz_base * f_ids[None, :, None] * t[:, None, :]   # (P, md, 1)
    terms = (factors[..., 0] * pows
             + factors[..., 1] * jnp.sin(x2)
             + factors[..., 2] * jnp.cos(x2))         # (P, md, D)
    mask = (f_ids < degree).astype(jnp.float32)[None, :, None]
    return (terms * mask).sum(axis=1) / max_degree    # (P, D)


if __name__ == "__main__":
    # Small deterministic problem: P points, max_degree frequency/poly terms, D=3 dims.
    P, MAX_DEGREE, D = 16, 4, 3
    DEGREE = 3
    POLY_BASE_FACTOR = 1.0
    HZ_BASE_FACTOR = 1.0

    key = jax.random.PRNGKey(0)
    k_f, k_t = jax.random.split(key)
    factors = jax.random.normal(k_f, (P, MAX_DEGREE, D, 3), dtype=jnp.float32)
    timestamp = jax.random.uniform(k_t, (P, 1), dtype=jnp.float32)

    out = poly_fourier_forward(factors, timestamp, DEGREE,
                               max_degree=MAX_DEGREE,
                               poly_base_factor=POLY_BASE_FACTOR,
                               Hz_base_factor=HZ_BASE_FACTOR)
    out = jax.block_until_ready(out)

    ref = poly_fourier_reference(factors, timestamp, DEGREE,
                                 max_degree=MAX_DEGREE,
                                 poly_base_factor=POLY_BASE_FACTOR,
                                 Hz_base_factor=HZ_BASE_FACTOR)
    ref = jax.block_until_ready(ref)

    assert out.shape == (P, D) and out.dtype == jnp.float32
    assert jnp.allclose(out, ref, atol=1e-5, rtol=1e-5), "mismatch vs reference"
    print("KERNEL_OK")
</pallas_src>

<mosaic_0001>
module attributes {stable_mosaic.version = 11 : i64} {
  func.func @_poly_fourier_kernel(%arg0: i32, %arg1: memref<1x128xf32, #tpu.memory_space<vmem>>, %arg2: memref<3x4x3x128xf32, #tpu.memory_space<vmem>>, %arg3: memref<3x128xf32, #tpu.memory_space<vmem>>) attributes {dimension_semantics = [#tpu.dimension_semantics<parallel>], iteration_bounds = array<i64: 1>, scalar_prefetch = 0 : i64, scratch_operands = 0 : i64, tpu.core_type = #tpu.core_type<tc>, window_params = [{transform_indices = @transform_0, window_bounds = array<i64: 1, 128>}, {transform_indices = @transform_1, window_bounds = array<i64: 3, 4, 3, 128>}, {transform_indices = @transform_2, window_bounds = array<i64: 3, 128>}]} {
    %c0 = arith.constant 0 : index
    %c0_0 = arith.constant 0 : index
    %0 = vector.load %arg1[%c0, %c0_0] : memref<1x128xf32, #tpu.memory_space<vmem>>, vector<1x128xf32>
    %cst = arith.constant 1.000000e+00 : f32
    %1 = vector.broadcast %cst : f32 to vector<1x128xf32>
    %2 = arith.mulf %1, %0 : vector<1x128xf32>
    %cst_1 = arith.constant 6.28318548 : f32
    %3 = vector.broadcast %cst_1 : f32 to vector<1x128xf32>
    %4 = arith.mulf %3, %0 : vector<1x128xf32>
    %5 = math.sin %4 : vector<1x128xf32>
    %6 = math.cos %4 : vector<1x128xf32>
    %cst_2 = arith.constant 0.000000e+00 : f32
    %7 = vector.broadcast %cst_2 : f32 to vector<3x128xf32>
    %cst_3 = arith.constant 1.000000e+00 : f32
    %8 = vector.broadcast %cst_3 : f32 to vector<1x128xf32>
    %cst_4 = arith.constant 0.000000e+00 : f32
    %9 = vector.broadcast %cst_4 : f32 to vector<1x128xf32>
    %cst_5 = arith.constant 1.000000e+00 : f32
    %10 = vector.broadcast %cst_5 : f32 to vector<1x128xf32>
    %c0_6 = arith.constant 0 : index
    %c0_7 = arith.constant 0 : index
    %c0_8 = arith.constant 0 : index
    %c0_9 = arith.constant 0 : index
    %11 = vector.load %arg2[%c0_6, %c0_7, %c0_8, %c0_9] : memref<3x4x3x128xf32, #tpu.memory_space<vmem>>, vector<1x1x3x128xf32>
    %12 = vector.shape_cast %11 : vector<1x1x3x128xf32> to vector<3x128xf32>
    %13 = vector.broadcast %8 : vector<1x128xf32> to vector<3x128xf32>
    %14 = arith.mulf %12, %13 : vector<3x128xf32>
    %c1 = arith.constant 1 : index
    %c0_10 = arith.constant 0 : index
    %c0_11 = arith.constant 0 : index
    %c0_12 = arith.constant 0 : index
    %15 = vector.load %arg2[%c1, %c0_10, %c0_11, %c0_12] : memref<3x4x3x128xf32, #tpu.memory_space<vmem>>, vector<1x1x3x128xf32>
    %16 = vector.shape_cast %15 : vector<1x1x3x128xf32> to vector<3x128xf32>
    %17 = vector.broadcast %9 : vector<1x128xf32> to vector<3x128xf32>
    %18 = arith.mulf %16, %17 : vector<3x128xf32>
    %19 = arith.addf %14, %18 : vector<3x128xf32>
    %c2 = arith.constant 2 : index
    %c0_13 = arith.constant 0 : index
    %c0_14 = arith.constant 0 : index
    %c0_15 = arith.constant 0 : index
    %20 = vector.load %arg2[%c2, %c0_13, %c0_14, %c0_15] : memref<3x4x3x128xf32, #tpu.memory_space<vmem>>, vector<1x1x3x128xf32>
    %21 = vector.shape_cast %20 : vector<1x1x3x128xf32> to vector<3x128xf32>
    %22 = vector.broadcast %10 : vector<1x128xf32> to vector<3x128xf32>
    %23 = arith.mulf %21, %22 : vector<3x128xf32>
    %24 = arith.addf %19, %23 : vector<3x128xf32>
    %25 = arith.addf %7, %24 : vector<3x128xf32>
    %26 = arith.mulf %8, %2 : vector<1x128xf32>
    %27 = arith.mulf %9, %6 : vector<1x128xf32>
    %28 = arith.mulf %10, %5 : vector<1x128xf32>
    %29 = arith.addf %27, %28 : vector<1x128xf32>
    %30 = arith.mulf %10, %6 : vector<1x128xf32>
    %31 = arith.mulf %9, %5 : vector<1x128xf32>
    %32 = arith.subf %30, %31 : vector<1x128xf32>
    %c0_16 = arith.constant 0 : index
    %c1_17 = arith.constant 1 : index
    %c0_18 = arith.constant 0 : index
    %c0_19 = arith.constant 0 : index
    %33 = vector.load %arg2[%c0_16, %c1_17, %c0_18, %c0_19] : memref<3x4x3x128xf32, #tpu.memory_space<vmem>>, vector<1x1x3x128xf32>
    %34 = vector.shape_cast %33 : vector<1x1x3x128xf32> to vector<3x128xf32>
    %35 = vector.broadcast %26 : vector<1x128xf32> to vector<3x128xf32>
    %36 = arith.mulf %34, %35 : vector<3x128xf32>
    %c1_20 = arith.constant 1 : index
    %c1_21 = arith.constant 1 : index
    %c0_22 = arith.constant 0 : index
    %c0_23 = arith.constant 0 : index
    %37 = vector.load %arg2[%c1_20, %c1_21, %c0_22, %c0_23] : memref<3x4x3x128xf32, #tpu.memory_space<vmem>>, vector<1x1x3x128xf32>
    %38 = vector.shape_cast %37 : vector<1x1x3x128xf32> to vector<3x128xf32>
    %39 = vector.broadcast %29 : vector<1x128xf32> to vector<3x128xf32>
    %40 = arith.mulf %38, %39 : vector<3x128xf32>
    %41 = arith.addf %36, %40 : vector<3x128xf32>
    %c2_24 = arith.constant 2 : index
    %c1_25 = arith.constant 1 : index
    %c0_26 = arith.constant 0 : index
    %c0_27 = arith.constant 0 : index
    %42 = vector.load %arg2[%c2_24, %c1_25, %c0_26, %c0_27] : memref<3x4x3x128xf32, #tpu.memory_space<vmem>>, vector<1x1x3x128xf32>
    %43 = vector.shape_cast %42 : vector<1x1x3x128xf32> to vector<3x128xf32>
    %44 = vector.broadcast %32 : vector<1x128xf32> to vector<3x128xf32>
    %45 = arith.mulf %43, %44 : vector<3x128xf32>
    %46 = arith.addf %41, %45 : vector<3x128xf32>
    %47 = arith.addf %25, %46 : vector<3x128xf32>
    %48 = arith.mulf %26, %2 : vector<1x128xf32>
    %49 = arith.mulf %29, %6 : vector<1x128xf32>
    %50 = arith.mulf %32, %5 : vector<1x128xf32>
    %51 = arith.addf %49, %50 : vector<1x128xf32>
    %52 = arith.mulf %32, %6 : vector<1x128xf32>
    %53 = arith.mulf %29, %5 : vector<1x128xf32>
    %54 = arith.subf %52, %53 : vector<1x128xf32>
    %c0_28 = arith.constant 0 : index
    %c2_29 = arith.constant 2 : index
    %c0_30 = arith.constant 0 : index
    %c0_31 = arith.constant 0 : index
    %55 = vector.load %arg2[%c0_28, %c2_29, %c0_30, %c0_31] : memref<3x4x3x128xf32, #tpu.memory_space<vmem>>, vector<1x1x3x128xf32>
    %56 = vector.shape_cast %55 : vector<1x1x3x128xf32> to vector<3x128xf32>
    %57 = vector.broadcast %48 : vector<1x128xf32> to vector<3x128xf32>
    %58 = arith.mulf %56, %57 : vector<3x128xf32>
    %c1_32 = arith.constant 1 : index
    %c2_33 = arith.constant 2 : index
    %c0_34 = arith.constant 0 : index
    %c0_35 = arith.constant 0 : index
    %59 = vector.load %arg2[%c1_32, %c2_33, %c0_34, %c0_35] : memref<3x4x3x128xf32, #tpu.memory_space<vmem>>, vector<1x1x3x128xf32>
    %60 = vector.shape_cast %59 : vector<1x1x3x128xf32> to vector<3x128xf32>
    %61 = vector.broadcast %51 : vector<1x128xf32> to vector<3x128xf32>
    %62 = arith.mulf %60, %61 : vector<3x128xf32>
    %63 = arith.addf %58, %62 : vector<3x128xf32>
    %c2_36 = arith.constant 2 : index
    %c2_37 = arith.constant 2 : index
    %c0_38 = arith.constant 0 : index
    %c0_39 = arith.constant 0 : index
    %64 = vector.load %arg2[%c2_36, %c2_37, %c0_38, %c0_39] : memref<3x4x3x128xf32, #tpu.memory_space<vmem>>, vector<1x1x3x128xf32>
    %65 = vector.shape_cast %64 : vector<1x1x3x128xf32> to vector<3x128xf32>
    %66 = vector.broadcast %54 : vector<1x128xf32> to vector<3x128xf32>
    %67 = arith.mulf %65, %66 : vector<3x128xf32>
    %68 = arith.addf %63, %67 : vector<3x128xf32>
    %69 = arith.addf %47, %68 : vector<3x128xf32>
    %cst_40 = arith.constant 2.500000e-01 : f32
    %70 = vector.broadcast %cst_40 : f32 to vector<3x128xf32>
    %71 = arith.mulf %69, %70 : vector<3x128xf32>
    %c0_41 = arith.constant 0 : index
    %c0_42 = arith.constant 0 : index
    %72 = vector.load %arg3[%c0_41, %c0_42] : memref<3x128xf32, #tpu.memory_space<vmem>>, vector<3x128xf32>
    tpu.vector_store %arg3[%c0_41, %c0_42], %71 {strides = array<i32>} : memref<3x128xf32, #tpu.memory_space<vmem>>, vector<3x128xf32>,
    return
  }
  func.func @transform_0(%arg0: i32) -> (i32, i32) {
    %c0_i32 = arith.constant 0 : i32
    %c0_i32_0 = arith.constant 0 : i32
    return %c0_i32, %arg0 : i32, i32
  }
  func.func @transform_1(%arg0: i32) -> (i32, i32, i32, i32) {
    %c0_i32 = arith.constant 0 : i32
    %c0_i32_0 = arith.constant 0 : i32
    %c0_i32_1 = arith.constant 0 : i32
    %c0_i32_2 = arith.constant 0 : i32
    return %c0_i32, %c0_i32_0, %c0_i32_1, %arg0 : i32, i32, i32, i32
  }
  func.func @transform_2(%arg0: i32) -> (i32, i32) {
    %c0_i32 = arith.constant 0 : i32
    %c0_i32_0 = arith.constant 0 : i32
    return %c0_i32, %arg0 : i32, i32
  }
}

</mosaic_0001>

<bundles_post_ra>
// kernel: tpu_custom_call.1
= control target key start
LH: loop header
LB: loop body
LE: loop exit
PB: predicated region body
PF: predicated region fallthrough
CT: control target
= control target key end

     0   :  { %7 = vsyncpa [#allocation3], 0  ;;  %v372_v13 = vmov 683565275   ;;  %v373_v15 = vmov 2475754826   ;;  %s463_s0 = inlined_call_operand.vmem [shape: f32[1,128], index: 0, kind: input, shape index: {}]   ;;  %s464_s1 = inlined_call_operand.vmem [shape: f32[3,4,3,128], index: 1, kind: input, shape index: {}]   ;;  %s465_s2 = inlined_call_operand.hbm [shape: f32[3,128], index: 2, kind: output, shape index: {}]  }
   0x1   :  { %v397_v0 = vld [vmem:[%s463_s0] sm:$0x1]  ;;  %v374_v17 = vmov 2131351028   ;;  %v375_v19 = vmov 2102212464  }
   0x2   :  { %v400_v1 = vmul.f32 6.2831855, %v397_v0  ;;  %v376_v21 = vmov 920167782   ;;  %v377_v28 = vmov 1326507024  }
   0x3   :  { %s378_s28 = smov [#allocation2]  }
   0x4   :  { %v17_v2 = vand.u32 2139095040, %v400_v1  ;;  %v14_v4 = vand.u32 2147483647, %v400_v1  ;;  %vm16_vm7 = vcmp.lt.s32.totalorder %v400_v1, 0  ;;  %vm106_vm15 = vweird.f32 %v400_v1  ;;  %s309_s29 = sshll.u32 %s378_s28, 4  ;;  %s310_s29 = int_to_ptr.vmem [resolvable:$true] %s309_s29 }
   0x5   :  { %s348_s30 = scalar_lea.vmem %s310_s29, 64  ;;  %p353_p1 = scmp.lt.s32.totalorder %s310_s29, %s310_s29 }
   0x6   :  { %v18_v3 = vshrl.u32 %v17_v2, 23  ;;  %v21_v7 = vand.u32 8388607, %v14_v4  ;;  %vm15_vm8 = vcmp.le.f32.partialorder %v14_v4, 0.7853982  ;;  %p349_p0 = scmp.ne.s32.totalorder %s310_s29, %s348_s30  ;;  %p354_p2 = scmp.lt.s32.totalorder %s348_s30, %s348_s30 }
   0x8   :  { %v317_v5 = vadd.s32 4294967169, %v18_v3  ;;  %v22_v10 = vor.u32 8388608, %v21_v7  ;;  %p355_p3 = por %p354_p2, %p353_p1 }
   0xa   :  { %v24_v6 = vadd.s32 1, %v317_v5  ;;  %v62_v30 = vshll.u32 %v22_v10, 8  ;;  %p356_p4 = pnand %p355_p3, %p349_p0 }
   0xc   :  { %vm25_vm0 = vcmp.gt.s32.totalorder %v24_v6, 0 }
   0xd   :  { %v26_v8 = vsel %vm25_vm0, %v24_v6, 0 }
   0xe   :  { %v28_v9 = vand.u32 31, %v26_v8  ;;  %v27_v11 = vshrl.u32 %v26_v8, 5 }
  0x10   :  { %v29_v12 = vsub.s32 32, %v28_v9  ;;  %v31_v14 = vshll.u32 %v372_v13, %v28_v9  ;;  %v34_v16 = vshll.u32 %v373_v15, %v28_v9  ;;  %v37_v18 = vshll.u32 %v374_v17, %v28_v9 }
  0x11   :  { %v40_v20 = vshll.u32 %v375_v19, %v28_v9  ;;  %v43_v22 = vshll.u32 %v376_v21, %v28_v9  ;;  %vm46_vm1 = vcmp.lt.s32.totalorder %v27_v11, 1  ;;  %vm49_vm2 = vcmp.lt.s32.totalorder %v27_v11, 4 }
  0x12   :  { %v30_v23 = vshrl.u32 %v372_v13, %v29_v12  ;;  %v32_v24 = vshrl.u32 %v373_v15, %v29_v12  ;;  %v35_v25 = vshrl.u32 %v374_v17, %v29_v12  ;;  %v38_v26 = vshrl.u32 %v375_v19, %v29_v12 }
  0x13   :  { %v41_v27 = vshrl.u32 %v376_v21, %v29_v12  ;;  %v44_v29 = vshrl.u32 %v377_v28, %v29_v12  ;;  %vm47_vm3 = vcmp.lt.s32.totalorder %v27_v11, 2  ;;  %vm48_vm4 = vcmp.lt.s32.totalorder %v27_v11, 3 }
  0x14   :  { %v33_v31 = vor.u32 %v32_v24, %v31_v14  ;;  %v36_v32 = vor.u32 %v35_v25, %v34_v16  ;;  %v39_v33 = vor.u32 %v38_v26, %v37_v18 }
  0x15   :  { %v42_v34 = vor.u32 %v41_v27, %v40_v20  ;;  %v45_v35 = vor.u32 %v44_v29, %v43_v22 }
  0x16   :  { %v50_v36 = vsel %vm46_vm1, %v30_v23, %v33_v31  ;;  %v51_v37 = vsel %vm49_vm2, %v39_v33, 2102212464  ;;  %v54_v38 = vsel %vm46_vm1, %v33_v31, %v36_v32  ;;  %v58_v39 = vsel %vm46_vm1, %v36_v32, %v39_v33 }
  0x17   :  { %v52_v40 = vsel %vm48_vm4, %v36_v32, %v51_v37  ;;  %v55_v41 = vsel %vm49_vm2, %v42_v34, 920167782  ;;  %v59_v42 = vsel %vm49_vm2, %v45_v35, 1326507024  ;;  %v237_v23 = vlaneseq }
  0x18   :  { %v56_v43 = vsel %vm48_vm4, %v39_v33, %v55_v41  ;;  %v60_v44 = vsel %vm48_vm4, %v42_v34, %v59_v42  ;;  %v53_v45 = vsel %vm47_vm3, %v50_v36, %v52_v40  ;;  %v325_v33 = vld [vmem:[%s464_s1 + $0x10] sm:$0x7] }
  0x19   :  { %v57_v46 = vsel %vm47_vm3, %v54_v38, %v56_v43  ;;  %v61_v47 = vsel %vm47_vm3, %v58_v39, %v60_v44  ;;  %v69_v52 = vmul.u32 %v62_v30, %v53_v45  ;;  %v238_v26 = vshrl.u32 %v237_v23, 7  ;;  %v327_v45 = vld [vmem:[%s464_s1 + $0x4] sm:$0x7] }
  0x1a   :  { %v406_v48 = vmul.u32.u64.low %v62_v30, %v61_v47  ;;  %v407_v49 = vmul.u32.u64.high %v62_v30, %v61_v47, %v406_v48  ;;  %v409_v50 = vmul.u32.u64.low %v62_v30, %v57_v46  ;;  %v410_v51 = vmul.u32.u64.high %v62_v30, %v57_v46, %v409_v50 }
  0x1b   :  { %v239_v30 = vsub.s32 0, %v238_v26  ;;  %v264_v38 = vmul.f32 %v397_v0, %v397_v0  ;;  %v224_v41 = vmul.f32 0.0, %v325_v33 }
  0x1c   :  { %vm71_vm5 = vc.u32 %v407_v49, %v409_v50  ;;  %v72_v53 = vadd.s32 1, %v410_v51  ;;  %v70_v2 = vadd.s32 %v409_v50, %v407_v49  ;;  %v328_v50 = vld [vmem:[%s464_s1 + $0x14] sm:$0x7] }
  0x1d   :  { %v240_v42 = vrot.slane %v397_v0, %v239_v30  ;;  %v329_v0 = vld [vmem:[%s464_s1 + $0x24] sm:$0x7] }
  0x1e   :  { %v73_v54 = vsel %vm71_vm5, %v72_v53, %v410_v51  ;;  %v277_v51 = vrot.slane %v264_v38, %v239_v30 }
  0x1f   :  { %v74_v55 = vadd.s32 %v73_v54, %v69_v52  ;;  %v242_v49 = vmul.f32 %v327_v45, %v240_v42 }
  0x21   :  { %v75_v56 = vadd.s32 536870912, %v74_v55 }
  0x23   :  { %v76_v57 = vshrl.u32 %v75_v56, 30  ;;  %v326_v56 = vld [vmem:[%s464_s1 + $0x20] sm:$0x7] }
  0x25   :  { %v77_v58 = vshll.u32 %v76_v57, 30  ;;  %v100_v15 = vsub.s32 4, %v76_v57 }
  0x27   :  { %v78_v59 = vsub.s32 %v74_v55, %v77_v58  ;;  %v101_v18 = vsel %vm16_vm7, %v100_v15, %v76_v57 }
  0x28   :  { %v103_v21 = vsel %vm15_vm8, 0, %v101_v18 }
  0x29   :  { %v80_v60 = vsub.s32 0, %v78_v59  ;;  %v107_v22 = vadd.s32 3, %v103_v21  ;;  %v211_v25 = vand.u32 3, %v103_v21 }
  0x2b   :  { %v318_v61 = vmin.u32 %v80_v60, %v78_v59  ;;  %v108_v24 = vand.u32 3, %v107_v22  ;;  %vm216_vm10 = vcmp.eq.s32.totalorder %v211_v25, 2  ;;  %vm213_vm12 = vcmp.eq.s32.totalorder %v211_v25, 0 }
  0x2c   :  { %vm212_vm14 = vcmp.lt.s32.totalorder %v211_v25, 2 }
  0x2d   :  { %v82_v62 = vclz %v318_v61  ;;  %vm113_vm9 = vcmp.eq.s32.totalorder %v108_v24, 2  ;;  %vm110_vm11 = vcmp.eq.s32.totalorder %v108_v24, 0  ;;  %vm109_vm13 = vcmp.lt.s32.totalorder %v108_v24, 2 }
  0x2f   :  { %v319_v63 = vadd.s32 4294967294, %v82_v62 }
  0x31   :  { %vm320_vm6 = vcmp.lt.s32.totalorder %v319_v63, 0 }
  0x32   :  { %v85_v3 = vsel %vm320_vm6, 0, %v319_v63 }
  0x33   :  { %v86_v5 = vsub.s32 32, %v85_v3  ;;  %v87_v6 = vshll.u32 %v78_v59, %v85_v3  ;;  %v90_v7 = vsub.s32 4294967266, %v85_v3  ;;  %v330_v59 = vld [vmem:[%s464_s1 + $0x8] sm:$0x7] }
  0x35   :  { %v88_v8 = vshrl.u32 %v70_v2, %v86_v5  ;;  %v91_v9 = vadd.s32 127, %v90_v7  ;;  %v331_v2 = vld [vmem:[%s464_s1 + $0x18] sm:$0x7] }
  0x37   :  { %v89_v10 = vor.u32 %v88_v8, %v87_v6  ;;  %v92_v11 = vshll.u32 %v91_v9, 23  ;;  %v279_v6 = vmul.f32 %v330_v59, %v277_v51  ;;  %v332_v8 = vld [vmem:[%s464_s1 + $0x28] sm:$0x7] }
  0x39   :  { %v93_v12 = vor.u32 4788187, %v92_v11  ;;  %v96_v13 = vcvt.s32.f32 %v89_v10 }
  0x3b   :  { %v94_v14 = vand.u32 2147483647, %v93_v12 }
  0x3d   :  { %v97_v16 = vmul.f32 %v96_v13, %v94_v14 }
  0x3f   :  { %v98_v17 = vxor.u32 2147483648, %v97_v16 }
  0x41   :  { %v99_v19 = vsel %vm16_vm7, %v98_v17, %v97_v16 }
  0x42   :  { %v102_v20 = vsel %vm15_vm8, %v400_v1, %v99_v19  ;;  %v221_v1 = vld [vmem:[%s464_s1] sm:$0x7] }
  0x43   :  { %344 = vcosq.f32 %v102_v20  ;;  %v225_v48 = vadd.f32 %v224_v41, %v221_v1 }
  0x44   :  { %346 = vsinq.f32 %v102_v20 }
  0x45   :  { %v228_v3 = vadd.f32 %v326_v56, %v225_v48 }
  0x4d   :  { %v345_v27 = vpop.eup %344 }
  0x4e   :  { %v347_v28 = vpop.eup %346  ;;  %v114_v29 = vxor.u32 2147483648, %v345_v27 }
  0x4f   :  { %v111_v4 = vxor.u32 2147483648, %v347_v28 }
  0x50   :  { %v115_v31 = vsel %vm113_vm9, %v114_v29, %v347_v28  ;;  %v218_v32 = vsel %vm216_vm10, %v114_v29, %v347_v28 }
  0x51   :  { %v112_v34 = vsel %vm110_vm11, %v345_v27, %v111_v4  ;;  %v215_v35 = vsel %vm213_vm12, %v345_v27, %v111_v4 }
  0x52   :  { %v116_v36 = vsel %vm109_vm13, %v112_v34, %v115_v31  ;;  %v219_v37 = vsel %vm212_vm14, %v215_v35, %v218_v32 }
  0x53   :  { %v117_v39 = vsel %vm106_vm15, nan, %v116_v36  ;;  %v220_v40 = vsel %vm106_vm15, nan, %v219_v37 }
  0x54   :  { %v230_v43 = vmul.f32 0.0, %v220_v40  ;;  %v232_v44 = vmul.f32 0.0, %v117_v39 }
  0x56   :  { %v231_v46 = vadd.f32 %v230_v43, %v117_v39  ;;  %v233_v47 = vsub.f32 %v220_v40, %v232_v44 }
  0x58   :  { %v249_v52 = vrot.slane %v231_v46, %v239_v30  ;;  %v259_v53 = vrot.slane %v233_v47, %v239_v30  ;;  %v265_v54 = vmul.f32 %v231_v46, %v220_v40  ;;  %v266_v55 = vmul.f32 %v233_v47, %v117_v39 }
  0x59   :  { %v268_v57 = vmul.f32 %v233_v47, %v220_v40  ;;  %v269_v58 = vmul.f32 %v231_v46, %v117_v39 }
  0x5a   :  { %v251_v60 = vmul.f32 %v328_v50, %v249_v52  ;;  %v261_v61 = vmul.f32 %v329_v0, %v259_v53  ;;  %v267_v62 = vadd.f32 %v266_v55, %v265_v54 }
  0x5b   :  { %v270_v63 = vsub.f32 %v268_v57, %v269_v58 }
  0x5c   :  { %v252_v5 = vadd.f32 %v251_v60, %v242_v49  ;;  %v286_v7 = vrot.slane %v267_v62, %v239_v30 }
  0x5d   :  { %v296_v9 = vrot.slane %v270_v63, %v239_v30 }
  0x5e   :  { %v262_v10 = vadd.f32 %v261_v61, %v252_v5  ;;  %v288_v11 = vmul.f32 %v331_v2, %v286_v7 }
  0x5f   :  { %v298_v12 = vmul.f32 %v332_v8, %v296_v9 }
  0x60   :  { %v263_v13 = vadd.f32 %v262_v10, %v228_v3  ;;  %v289_v14 = vadd.f32 %v288_v11, %v279_v6 }
  0x62   :  { %v299_v15 = vadd.f32 %v298_v12, %v289_v14 }
  0x64   :  { %v300_v16 = vadd.f32 %v299_v15, %v263_v13 }
  0x66   :  { %v301_v17 = vmul.f32 0.25, %v300_v16 }
  0x68   :  { %302 = vst [vmem:[#allocation2] sm:$0x7] %v301_v17 }
  0x69   :  { %359 = shalt.err (!%p356_p4)
}
  0x6a   :  { %s360_s4 = scalar_lea.hbm %s465_s2, 64 }
  0x6b   :  { %p361_p5 = scmp.ne.s32.totalorder %s465_s2, %s360_s4  ;;  %p364_p6 = scmp.lt.u32.totalorder %s360_s4, %s465_s2 }
  0x6d   :  { %p366_p7 = pnand %p364_p6, %p361_p5 }
  0x6f   :  { %369 = shalt.err (!%p366_p7)
}
  0x70   :  { %312 = dma.vmem_to_hbm [thread:$0]  %s310_s29, 64, %s465_s2, [#allocation3]  }
  0x71   :  { %370 = dma.done.wait [#allocation3], 64  }
  0x72   :  { %371 = vsyncadd [#allocation3], 4294967232 }
  0x73   :  { %316 = vsyncpa [#allocation3], 1 }

</bundles_post_ra>
